<compile_context>
chip_gen: v6e
topology: v6e:2x2x1
jax: 0.10.0
libtpu: 0.0.40
codegen_flags: <defaults>
</compile_context>

<pallas_src>
import functools
import math

import jax
import jax.numpy as jnp
from jax.experimental import pallas as pl
from jax.experimental.pallas import tpu as pltpu


def dueling_q_kernel(x_ref, fw0_ref, fw1_ref, hw_ref, ow_ref, b_ref, q_ref,
                     *, h0, h1, head_h, action_size, out_w, use_bf16):
    cdt = jnp.bfloat16 if use_bf16 else jnp.float32

    # Packed biases (f32): row 0 = fb0, 1 = fb1, 2 = [ab0|vb0],
    #                      3 = [ab1|vb1|0...] (padded to out_w lanes)
    b = b_ref[...]
    fb0 = b[0:1, :h0]
    fb1 = b[1:2, :h1]
    hb = b[2:3, :head_h]
    ob = b[3:4, :out_w]

    x = x_ref[...]  # already cast to compute dtype by the wrapper

    # ---- feature layer (ReLU after both Linears: output_activation=True)
    a0 = jnp.dot(x, fw0_ref[...], preferred_element_type=jnp.float32) + fb0
    a0 = jnp.maximum(a0, 0.0)
    feat = jnp.dot(a0.astype(cdt), fw1_ref[...],
                   preferred_element_type=jnp.float32) + fb1
    feat = jnp.maximum(feat, 0.0)

    # ---- fused advantage|value hidden layer (one dot + ReLU)
    hh = jnp.dot(feat.astype(cdt), hw_ref[...],
                 preferred_element_type=jnp.float32) + hb
    hh = jnp.maximum(hh, 0.0)

    # ---- fused block-diagonal output layer, padded to 128 lanes:
    #      columns [:A] = advantage, column A = value, columns >A = 0
    av = jnp.dot(hh.astype(cdt), ow_ref[...],
                 preferred_element_type=jnp.float32) + ob

    # Full-lane-width masked reductions (XLU) instead of narrow lane slices.
    lane = jax.lax.broadcasted_iota(jnp.int32, av.shape, 1)
    adv_sum = jnp.sum(jnp.where(lane < action_size, av, 0.0),
                      axis=-1, keepdims=True)
    val = jnp.sum(jnp.where(lane == action_size, av, 0.0),
                  axis=-1, keepdims=True)

    inv_a = 1.0 / float(action_size)  # static reciprocal: no per-elem divide
    # Lane-dense unmasked store: columns >= action_size are ignored by wrapper.
    q_ref[...] = (val + av - adv_sum * inv_a).astype(q_ref.dtype)


def pack_params(params, use_bf16=False):
    """Fuse the adv/value heads and pack biases into a single array (once)."""
    wdt = jnp.bfloat16 if use_bf16 else jnp.float32
    fw0, fb0 = params["fw0"], params["fb0"]
    fw1, fb1 = params["fw1"], params["fb1"]
    aw0, ab0 = params["aw0"], params["ab0"]
    aw1, ab1 = params["aw1"], params["ab1"]
    vw0, vb0 = params["vw0"], params["vb0"]
    vw1, vb1 = params["vw1"], params["vb1"]

    h0 = fw0.shape[1]
    h1 = fw1.shape[1]
    adv_h = aw0.shape[1]
    val_h = vw0.shape[1]
    action_size = aw1.shape[1]
    head_h = adv_h + val_h

    # Output width padded to a lane multiple (128) for unmasked stores.
    out_w = 128 * (-(-(action_size + 1) // 128))

    # Fused head hidden weight: [h1, adv_h + val_h]
    hw = jnp.concatenate([aw0, vw0], axis=1)

    # Fused block-diagonal output weight: [head_h, out_w]
    ow = jnp.zeros((head_h, out_w), jnp.float32)
    ow = ow.at[:adv_h, :action_size].set(aw1)
    ow = ow.at[adv_h:, action_size:action_size + 1].set(vw1)

    # All biases in one lane-0-aligned [4, maxw] array (single DMA).
    maxw = max(h0, h1, head_h, out_w)
    bpack = jnp.zeros((4, maxw), jnp.float32)
    bpack = bpack.at[0, :h0].set(fb0[0])
    bpack = bpack.at[1, :h1].set(fb1[0])
    bpack = bpack.at[2, :head_h].set(jnp.concatenate([ab0, vb0], axis=1)[0])
    bpack = bpack.at[3, :action_size + 1].set(
        jnp.concatenate([ab1, vb1], axis=1)[0])

    dims = dict(h0=h0, h1=h1, head_h=head_h,
                action_size=action_size, out_w=out_w)
    return dict(fw0=fw0.astype(wdt), fw1=fw1.astype(wdt),
                hw=hw.astype(wdt), ow=ow.astype(wdt),
                bpack=bpack, dims=dims, use_bf16=use_bf16)


def dueling_q_forward(state, packed, *, block_batch=256):
    """state: [batch, *obs_shape] -> q: [batch, action_size] float32."""
    batch = state.shape[0]
    dims = packed["dims"]
    use_bf16 = packed["use_bf16"]
    action_size = dims["action_size"]
    out_w = dims["out_w"]

    x = state.reshape(batch, -1).astype(jnp.float32)
    state_size = x.shape[1]

    # Pad the batch to a full-sublane multiple, then tile it over a parallel
    # grid: weights keep a constant index_map (VMEM-resident across steps) and
    # the batch axis is sharded across TensorCores on megacore parts.
    align = 16 if use_bf16 else 8
    pb = -(-batch // align) * align
    bb = min(block_batch, pb)
    bb = -(-bb // align) * align
    pb = -(-pb // bb) * bb
    if pb != batch:
        x = jnp.pad(x, ((0, pb - batch), (0, 0)))
    if use_bf16:
        x = x.astype(jnp.bfloat16)

    grid = (pb // bb,)
    kernel = functools.partial(dueling_q_kernel, use_bf16=use_bf16, **dims)

    def resident(shape):
        return pl.BlockSpec(shape, lambda i: (0, 0))

    q = pl.pallas_call(
        kernel,
        out_shape=jax.ShapeDtypeStruct((pb, out_w), jnp.float32),
        grid=grid,
        in_specs=[
            pl.BlockSpec((bb, state_size), lambda i: (i, 0)),  # x: batch-tiled
            resident(packed["fw0"].shape),
            resident(packed["fw1"].shape),
            resident(packed["hw"].shape),
            resident(packed["ow"].shape),
            resident(packed["bpack"].shape),
        ],
        out_specs=pl.BlockSpec((bb, out_w), lambda i: (i, 0)),
        compiler_params=pltpu.CompilerParams(
            dimension_semantics=("parallel",)),
    )(x, packed["fw0"], packed["fw1"], packed["hw"], packed["ow"],
      packed["bpack"])
    return q[:batch, :action_size]


def _linear_params(key, fan_in, fan_out):
    """PyTorch nn.Linear default init: U(-1/sqrt(fan_in), 1/sqrt(fan_in))."""
    kw, kb = jax.random.split(key)
    bound = 1.0 / math.sqrt(fan_in)
    w = jax.random.uniform(kw, (fan_in, fan_out), jnp.float32, -bound, bound)
    b = jax.random.uniform(kb, (1, fan_out), jnp.float32, -bound, bound)
    return w, b


def make_params(key, state_size, hiddens, adv_hidden, val_hidden, action_size):
    keys = jax.random.split(key, 6)
    fw0, fb0 = _linear_params(keys[0], state_size, hiddens[0])
    fw1, fb1 = _linear_params(keys[1], hiddens[0], hiddens[1])
    aw0, ab0 = _linear_params(keys[2], hiddens[1], adv_hidden)
    aw1, ab1 = _linear_params(keys[3], adv_hidden, action_size)
    vw0, vb0 = _linear_params(keys[4], hiddens[1], val_hidden)
    vw1, vb1 = _linear_params(keys[5], val_hidden, 1)
    return dict(fw0=fw0, fb0=fb0, fw1=fw1, fb1=fb1,
                aw0=aw0, ab0=ab0, aw1=aw1, ab1=ab1,
                vw0=vw0, vb0=vb0, vw1=vw1, vb1=vb1)


def reference_forward(state, params):
    """Pure-JAX reference (unfused) for correctness checking."""
    x = state.reshape(state.shape[0], -1).astype(jnp.float32)
    h = jnp.maximum(x @ params["fw0"] + params["fb0"], 0.0)
    feat = jnp.maximum(h @ params["fw1"] + params["fb1"], 0.0)
    ah = jnp.maximum(feat @ params["aw0"] + params["ab0"], 0.0)
    adv = ah @ params["aw1"] + params["ab1"]
    vh = jnp.maximum(feat @ params["vw0"] + params["vb0"], 0.0)
    val = vh @ params["vw1"] + params["vb1"]
    return val + adv - jnp.mean(adv, axis=-1, keepdims=True)


if __name__ == "__main__":
    key = jax.random.PRNGKey(0)
    k_params, k_state, k_state2 = jax.random.split(key, 3)

    # obs_space.shape = (4, 4) -> state_size = 16; hiddens = [64, 32];
    # advantage = [32]; value = [32]; action_space.n = 6
    batch, obs_shape = 2, (4, 4)
    state_size = obs_shape[0] * obs_shape[1]
    hiddens, adv_hidden, val_hidden, action_size = [64, 32], 32, 32, 6

    params = make_params(k_params, state_size, hiddens, adv_hidden,
                         val_hidden, action_size)
    packed_f32 = pack_params(params, use_bf16=False)

    # ---- small-batch f32 run (single grid step, padded to 8 sublanes)
    state = jax.random.normal(k_state, (batch,) + obs_shape, dtype=jnp.float32)
    q = jax.block_until_ready(dueling_q_forward(state, packed_f32))
    q_ref = reference_forward(state, params)
    assert q.shape == (batch, action_size)
    assert jnp.allclose(q, q_ref, atol=1e-4, rtol=1e-4), \
        "Pallas kernel mismatch vs reference (f32)"

    # ---- multi-tile batch grid (batch 40 padded to 48, 3 parallel steps)
    state_big = jax.random.normal(k_state2, (40,) + obs_shape,
                                  dtype=jnp.float32)
    q_big = jax.block_until_ready(
        dueling_q_forward(state_big, packed_f32, block_batch=16))
    q_big_ref = reference_forward(state_big, params)
    assert q_big.shape == (40, action_size)
    assert jnp.allclose(q_big, q_big_ref, atol=1e-4, rtol=1e-4), \
        "Pallas kernel mismatch vs reference (batch grid)"

    # ---- bf16 MXU-operand path (v6e/v7x): f32 accumulate / f32 elementwise
    packed_bf16 = pack_params(params, use_bf16=True)
    q_bf16 = jax.block_until_ready(dueling_q_forward(state_big, packed_bf16))
    assert q_bf16.shape == (40, action_size)
    assert bool(jnp.all(jnp.isfinite(q_bf16)))
    assert jnp.allclose(q_bf16, q_big_ref, atol=1e-1, rtol=1e-1), \
        "Pallas kernel mismatch vs reference (bf16)"

    print("KERNEL_OK")
</pallas_src>

<mosaic_0001>
module attributes {stable_mosaic.version = 11 : i64} {
  func.func @dueling_q_kernel(%arg0: i32, %arg1: memref<8x16xf32, #tpu.memory_space<vmem>>, %arg2: memref<16x64xf32, #tpu.memory_space<vmem>>, %arg3: memref<64x32xf32, #tpu.memory_space<vmem>>, %arg4: memref<32x64xf32, #tpu.memory_space<vmem>>, %arg5: memref<64x128xf32, #tpu.memory_space<vmem>>, %arg6: memref<4x128xf32, #tpu.memory_space<vmem>>, %arg7: memref<8x128xf32, #tpu.memory_space<vmem>>) attributes {dimension_semantics = [#tpu.dimension_semantics<parallel>], iteration_bounds = array<i64: 1>, scalar_prefetch = 0 : i64, scratch_operands = 0 : i64, tpu.core_type = #tpu.core_type<tc>, window_params = [{transform_indices = @transform_0, window_bounds = array<i64: 8, 16>}, {pipeline_mode = #tpu.pipeline_mode<synchronous>, transform_indices = @transform_1, window_bounds = array<i64: 16, 64>}, {pipeline_mode = #tpu.pipeline_mode<synchronous>, transform_indices = @transform_2, window_bounds = array<i64: 64, 32>}, {pipeline_mode = #tpu.pipeline_mode<synchronous>, transform_indices = @transform_3, window_bounds = array<i64: 32, 64>}, {pipeline_mode = #tpu.pipeline_mode<synchronous>, transform_indices = @transform_4, window_bounds = array<i64: 64, 128>}, {pipeline_mode = #tpu.pipeline_mode<synchronous>, transform_indices = @transform_5, window_bounds = array<i64: 4, 128>}, {transform_indices = @transform_6, window_bounds = array<i64: 8, 128>}]} {
    %c0 = arith.constant 0 : index
    %c0_0 = arith.constant 0 : index
    %0 = vector.load %arg6[%c0, %c0_0] : memref<4x128xf32, #tpu.memory_space<vmem>>, vector<4x128xf32>
    %1 = vector.extract_strided_slice %0 {offsets = [0, 0], sizes = [1, 64], strides = [1, 1]} : vector<4x128xf32> to vector<1x64xf32>
    %2 = vector.extract_strided_slice %0 {offsets = [1, 0], sizes = [1, 32], strides = [1, 1]} : vector<4x128xf32> to vector<1x32xf32>
    %3 = vector.extract_strided_slice %0 {offsets = [2, 0], sizes = [1, 64], strides = [1, 1]} : vector<4x128xf32> to vector<1x64xf32>
    %4 = vector.extract_strided_slice %0 {offsets = [3, 0], sizes = [1, 128], strides = [1, 1]} : vector<4x128xf32> to vector<1x128xf32>
    %c0_1 = arith.constant 0 : index
    %c0_2 = arith.constant 0 : index
    %5 = vector.load %arg1[%c0_1, %c0_2] : memref<8x16xf32, #tpu.memory_space<vmem>>, vector<8x16xf32>
    %c0_3 = arith.constant 0 : index
    %c0_4 = arith.constant 0 : index
    %6 = vector.load %arg2[%c0_3, %c0_4] : memref<16x64xf32, #tpu.memory_space<vmem>>, vector<16x64xf32>
    %cst = arith.constant dense<0.000000e+00> : vector<8x64xf32>
    %7 = tpu.matmul %5, %6, %cst {dimension_numbers = #tpu.dot_dimension_numbers<[1], [0], [0], [1], [0, 0, 1, 1], [], []>} : vector<8x16xf32>, vector<16x64xf32>, vector<8x64xf32> -> vector<8x64xf32>
    %8 = vector.broadcast %1 : vector<1x64xf32> to vector<8x64xf32>
    %9 = arith.addf %7, %8 : vector<8x64xf32>
    %cst_5 = arith.constant 0.000000e+00 : f32
    %10 = vector.broadcast %cst_5 : f32 to vector<8x64xf32>
    %11 = arith.maximumf %9, %10 : vector<8x64xf32>
    %c0_6 = arith.constant 0 : index
    %c0_7 = arith.constant 0 : index
    %12 = vector.load %arg3[%c0_6, %c0_7] : memref<64x32xf32, #tpu.memory_space<vmem>>, vector<64x32xf32>
    %cst_8 = arith.constant dense<0.000000e+00> : vector<8x32xf32>
    %13 = tpu.matmul %11, %12, %cst_8 {dimension_numbers = #tpu.dot_dimension_numbers<[1], [0], [0], [1], [0, 0, 1, 1], [], []>} : vector<8x64xf32>, vector<64x32xf32>, vector<8x32xf32> -> vector<8x32xf32>
    %14 = vector.broadcast %2 : vector<1x32xf32> to vector<8x32xf32>
    %15 = arith.addf %13, %14 : vector<8x32xf32>
    %cst_9 = arith.constant 0.000000e+00 : f32
    %16 = vector.broadcast %cst_9 : f32 to vector<8x32xf32>
    %17 = arith.maximumf %15, %16 : vector<8x32xf32>
    %c0_10 = arith.constant 0 : index
    %c0_11 = arith.constant 0 : index
    %18 = vector.load %arg4[%c0_10, %c0_11] : memref<32x64xf32, #tpu.memory_space<vmem>>, vector<32x64xf32>
    %cst_12 = arith.constant dense<0.000000e+00> : vector<8x64xf32>
    %19 = tpu.matmul %17, %18, %cst_12 {dimension_numbers = #tpu.dot_dimension_numbers<[1], [0], [0], [1], [0, 0, 1, 1], [], []>} : vector<8x32xf32>, vector<32x64xf32>, vector<8x64xf32> -> vector<8x64xf32>
    %20 = vector.broadcast %3 : vector<1x64xf32> to vector<8x64xf32>
    %21 = arith.addf %19, %20 : vector<8x64xf32>
    %cst_13 = arith.constant 0.000000e+00 : f32
    %22 = vector.broadcast %cst_13 : f32 to vector<8x64xf32>
    %23 = arith.maximumf %21, %22 : vector<8x64xf32>
    %c0_14 = arith.constant 0 : index
    %c0_15 = arith.constant 0 : index
    %24 = vector.load %arg5[%c0_14, %c0_15] : memref<64x128xf32, #tpu.memory_space<vmem>>, vector<64x128xf32>
    %cst_16 = arith.constant dense<0.000000e+00> : vector<8x128xf32>
    %25 = tpu.matmul %23, %24, %cst_16 {dimension_numbers = #tpu.dot_dimension_numbers<[1], [0], [0], [1], [0, 0, 1, 1], [], []>} : vector<8x64xf32>, vector<64x128xf32>, vector<8x128xf32> -> vector<8x128xf32>
    %26 = vector.broadcast %4 : vector<1x128xf32> to vector<8x128xf32>
    %27 = arith.addf %25, %26 : vector<8x128xf32>
    %28 = tpu.iota {dimensions = array<i32: 1>} : vector<8x128xi32>
    %c6_i32 = arith.constant 6 : i32
    %29 = vector.broadcast %c6_i32 : i32 to vector<8x128xi32>
    %30 = arith.cmpi slt, %28, %29 : vector<8x128xi32>
    %cst_17 = arith.constant 0.000000e+00 : f32
    %31 = vector.broadcast %cst_17 : f32 to vector<8x128xf32>
    %32 = arith.select %30, %27, %31 : vector<8x128xi1>, vector<8x128xf32>
    %cst_18 = arith.constant dense<0.000000e+00> : vector<8xf32>
    %33 = vector.multi_reduction <add>, %32, %cst_18 [1] : vector<8x128xf32> to vector<8xf32>
    %34 = vector.shape_cast %33 : vector<8xf32> to vector<8x1xf32>
    %c6_i32_19 = arith.constant 6 : i32
    %35 = vector.broadcast %c6_i32_19 : i32 to vector<8x128xi32>
    %36 = arith.cmpi eq, %28, %35 : vector<8x128xi32>
    %cst_20 = arith.constant 0.000000e+00 : f32
    %37 = vector.broadcast %cst_20 : f32 to vector<8x128xf32>
    %38 = arith.select %36, %27, %37 : vector<8x128xi1>, vector<8x128xf32>
    %cst_21 = arith.constant dense<0.000000e+00> : vector<8xf32>
    %39 = vector.multi_reduction <add>, %38, %cst_21 [1] : vector<8x128xf32> to vector<8xf32>
    %40 = vector.shape_cast %39 : vector<8xf32> to vector<8x1xf32>
    %41 = vector.broadcast %40 : vector<8x1xf32> to vector<8x128xf32>
    %42 = arith.addf %41, %27 : vector<8x128xf32>
    %cst_22 = arith.constant 0.166666672 : f32
    %43 = vector.broadcast %cst_22 : f32 to vector<8x1xf32>
    %44 = arith.mulf %34, %43 : vector<8x1xf32>
    %45 = vector.broadcast %44 : vector<8x1xf32> to vector<8x128xf32>
    %46 = arith.subf %42, %45 : vector<8x128xf32>
    %c0_23 = arith.constant 0 : index
    %c0_24 = arith.constant 0 : index
    %47 = vector.load %arg7[%c0_23, %c0_24] : memref<8x128xf32, #tpu.memory_space<vmem>>, vector<8x128xf32>
    tpu.vector_store %arg7[%c0_23, %c0_24], %46 {strides = array<i32>} : memref<8x128xf32, #tpu.memory_space<vmem>>, vector<8x128xf32>,
    return
  }
  func.func @transform_0(%arg0: i32) -> (i32, i32) {
    %c0_i32 = arith.constant 0 : i32
    %c0_i32_0 = arith.constant 0 : i32
    return %arg0, %c0_i32 : i32, i32
  }
  func.func @transform_1(%arg0: i32) -> (i32, i32) {
    %c0_i32 = arith.constant 0 : i32
    %c0_i32_0 = arith.constant 0 : i32
    %c0_i32_1 = arith.constant 0 : i32
    return %c0_i32, %c0_i32_0 : i32, i32
  }
  func.func @transform_2(%arg0: i32) -> (i32, i32) {
    %c0_i32 = arith.constant 0 : i32
    %c0_i32_0 = arith.constant 0 : i32
    %c0_i32_1 = arith.constant 0 : i32
    return %c0_i32, %c0_i32_0 : i32, i32
  }
  func.func @transform_3(%arg0: i32) -> (i32, i32) {
    %c0_i32 = arith.constant 0 : i32
    %c0_i32_0 = arith.constant 0 : i32
    %c0_i32_1 = arith.constant 0 : i32
    return %c0_i32, %c0_i32_0 : i32, i32
  }
  func.func @transform_4(%arg0: i32) -> (i32, i32) {
    %c0_i32 = arith.constant 0 : i32
    %c0_i32_0 = arith.constant 0 : i32
    %c0_i32_1 = arith.constant 0 : i32
    return %c0_i32, %c0_i32_0 : i32, i32
  }
  func.func @transform_5(%arg0: i32) -> (i32, i32) {
    %c0_i32 = arith.constant 0 : i32
    %c0_i32_0 = arith.constant 0 : i32
    %c0_i32_1 = arith.constant 0 : i32
    return %c0_i32, %c0_i32_0 : i32, i32
  }
  func.func @transform_6(%arg0: i32) -> (i32, i32) {
    %c0_i32 = arith.constant 0 : i32
    %c0_i32_0 = arith.constant 0 : i32
    return %arg0, %c0_i32 : i32, i32
  }
}

</mosaic_0001>

<bundles_post_ra>
// kernel: tpu_custom_call.1
= control target key start
LH: loop header
LB: loop body
LE: loop exit
PB: predicated region body
PF: predicated region fallthrough
CT: control target
= control target key end

     0   :  { %11 = vsyncpa [#allocation3], 0  ;;  %s723_s0 = inlined_call_operand.hbm [shape: f32[8,16], index: 0, kind: input, shape index: {}]   ;;  %s724_s1 = inlined_call_operand.hbm [shape: f32[16,64], index: 1, kind: input, shape index: {}]   ;;  %s725_s2 = inlined_call_operand.vmem [shape: f32[64,32], index: 2, kind: input, shape index: {}]   ;;  %s726_s3 = inlined_call_operand.vmem [shape: f32[32,64], index: 3, kind: input, shape index: {}]   ;;  %s727_s4 = inlined_call_operand.vmem [shape: f32[64,128], index: 4, kind: input, shape index: {}]   ;;  %s728_s5 = inlined_call_operand.vmem [shape: f32[4,128], index: 5, kind: input, shape index: {}]   ;;  %s729_s6 = inlined_call_operand.hbm [shape: f32[8,128], index: 6, kind: output, shape index: {}]  }
   0x1   :  { %12 = vsyncpa [#allocation6], 0 }
   0x2   :  { %13 = vsyncpa [#allocation4], 0  ;;  %s577_s21 = smov [#allocation2]   ;;  %s578_s23 = smov [#allocation5]  }
   0x3   :  { %s20_s22 = sshll.u32 %s577_s21, 4  ;;  %s29_s24 = sshll.u32 %s578_s23, 4  ;;  %s21_s22 = int_to_ptr.vmem [resolvable:$true] %s20_s22  ;;  %s30_s24 = int_to_ptr.vmem [resolvable:$true] %s29_s24 }
   0x4   :  { %s519_s25 = scalar_lea.vmem %s21_s22, 128  ;;  %p524_p1 = scmp.lt.s32.totalorder %s21_s22, %s21_s22 }
   0x5   :  { %p520_p0 = scmp.ne.s32.totalorder %s21_s22, %s519_s25  ;;  %p525_p2 = scmp.lt.s32.totalorder %s519_s25, %s519_s25 }
   0x7   :  { %p526_p3 = por %p525_p2, %p524_p1 }
   0x9   :  { %p527_p4 = pnand %p526_p3, %p520_p0 }
   0xb   :  { %530 = shalt.err (!%p527_p4)
}
   0xc   :  { %23 = dma.hbm_to_vmem [thread:$0]  %s723_s0, 128, %s21_s22, [#allocation3]  }
   0xd   :  { %s539_s28 = scalar_lea.vmem %s30_s24, 256  ;;  %p544_p6 = scmp.lt.s32.totalorder %s30_s24, %s30_s24 }
   0xe   :  { %p540_p5 = scmp.ne.s32.totalorder %s30_s24, %s539_s28  ;;  %p545_p7 = scmp.lt.s32.totalorder %s539_s28, %s539_s28 }
  0x10   :  { %p546_p8 = por %p545_p7, %p544_p6 }
  0x12   :  { %p547_p9 = pnand %p546_p8, %p540_p5 }
  0x14   :  { %550 = shalt.err (!%p547_p9)
}
  0x15   :  { %s579_s29 = smov 128   ;;  %s580_s30 = smov 8  }
  0x16   :  { %35 = dma.hbm_to_vmem [thread:$0]  %s724_s1, 256, %s30_s24, [#allocation6], %s579_s29, %s579_s29, %s580_s30  }
  0x17   :  { %571 = dma.done.wait [#allocation3], 128  }
  0x18   :  { %572 = vsyncadd [#allocation3], 4294967168 }
  0x19   :  { %573 = dma.done.wait [#allocation6], 256  }
  0x1a   :  { %574 = vsyncadd [#allocation6], 4294967040  ;;  %v581_v0 = vmov 0.0   ;;  %vm582_vm0 = vmmov 0   ;;  %v53_v1 = vld [vmem:[#allocation5 + $0x8] sm:$0xff]  ;;  %v52_v2 = vld [vmem:[#allocation5] sm:$0xff]  ;;  %v54_v13 = vlaneseq }
  0x1b   :  { %448 = vmatprep.subr.mxu1 %v581_v0  ;;  %452 = vmatprep.mubr.msk.f32.mxu1 %vm582_vm0, %v581_v0  ;;  %v51_v3 = vld [vmem:[#allocation2] sm:$0xff]  ;;  %vm58_vm1 = vcmask 130048   ;;  %v140_v4 = vld [vmem:[%s725_s2 + $0x38] sm:$0xff]  ;;  %v139_v5 = vld [vmem:[%s725_s2 + $0x30] sm:$0xff]  ;;  %vm145_vm2 = vcmask 523264   ;;  %vm228_vm3 = vcmask 261120  }
  0x1c   :  { %474 = vmatprep.subr.mxu0 %v581_v0  ;;  %482 = vmatprep.mubr.msk.f32.mxu0 %vm582_vm0, %v581_v0  ;;  %v138_v6 = vld [vmem:[%s725_s2 + $0x28] sm:$0xff]  ;;  %v137_v7 = vld [vmem:[%s725_s2 + $0x20] sm:$0xff]  ;;  %v136_v8 = vld [vmem:[%s725_s2 + $0x18] sm:$0xff]  ;;  %v55_v14 = vshrl.u32 %v54_v13, 7  ;;  %v389_v46 = vand.u32 127, %v54_v13 }
  0x1d   :  { %449 = vmatpush3.msra.mxu1 %v53_v1  ;;  %v135_v9 = vld [vmem:[%s725_s2 + $0x10] sm:$0xff]  ;;  %v134_v10 = vld [vmem:[%s725_s2 + $0x8] sm:$0xff]  ;;  %v133_v11 = vld [vmem:[%s725_s2] sm:$0xff] }
  0x1e   :  { %450 = vmatprep.subr.mxu1 %v581_v0  ;;  %v223_v12 = vld [vmem:[%s726_s3 + $0x18] sm:$0xff]  ;;  %v56_v15 = vsub.s32 0, %v55_v14  ;;  %v50_v16 = vld [vmem:[%s728_s5] sm:$0xf]  ;;  %v222_v22 = vld [vmem:[%s726_s3 + $0x10] sm:$0xff]  ;;  %v143_v25 = vsub.s32 1, %v55_v14 }
  0x1f   :  { %451 = vmatpush3.msra.mxu1 %v52_v2  ;;  %475 = vmatpush3.msra.mxu0 %v223_v12  ;;  %v221_v23 = vld [vmem:[%s726_s3 + $0x8] sm:$0xff]  ;;  %v220_v24 = vld [vmem:[%s726_s3] sm:$0xff]  ;;  %v310_v31 = vld [vmem:[%s727_s4 + $0x38] sm:$0xff]  ;;  %v226_v39 = vsub.s32 2, %v55_v14  ;;  %v313_v45 = vsub.s32 3, %v55_v14  ;;  %vm390_vm4 = vcmp.lt.s32.totalorder %v389_v46, 6 }
  0x20   :  { %453 = vmatmul.mubr.msk.f32.vlgmr.msra.gmra.mxu1 %vm58_vm1, %v51_v3  ;;  %455 = vmatprep.subr.mxu1 %v581_v0  ;;  %v57_v17 = vrot.slane %v50_v16, %v56_v15  ;;  %v144_v26 = vrot.slane %v50_v16, %v143_v25  ;;  %v309_v32 = vld [vmem:[%s727_s4 + $0x30] sm:$0xff]  ;;  %v308_v33 = vld [vmem:[%s727_s4 + $0x28] sm:$0xff]  ;;  %v307_v34 = vld [vmem:[%s727_s4 + $0x20] sm:$0xff]  ;;  %vm394_vm5 = vcmp.eq.s32.totalorder %v389_v46, 6 }
  0x21   :  { %456 = vmatpush3.msra.mxu1 %v140_v4  ;;  %471 = vmatprep.mubr.msk.f32.mxu1 %vm582_vm0, %v581_v0  ;;  %v306_v35 = vld [vmem:[%s727_s4 + $0x18] sm:$0xff]  ;;  %v305_v36 = vld [vmem:[%s727_s4 + $0x10] sm:$0xff]  ;;  %v304_v37 = vld [vmem:[%s727_s4 + $0x8] sm:$0xff]  ;;  %v227_v40 = vrot.slane %v50_v16, %v226_v39  ;;  %v314_v47 = vrot.slane %v50_v16, %v313_v45 }
  0x22   :  { %457 = vmatprep.subr.mxu1 %v581_v0  ;;  %476 = vmatprep.subr.mxu0 %v581_v0  ;;  %v303_v38 = vld [vmem:[%s727_s4] sm:$0xff]  ;;  %s583_s4 = smov [#allocation7]  }
  0x23   :  { %458 = vmatpush3.msra.mxu1 %v139_v5  ;;  %477 = vmatpush3.msra.mxu0 %v222_v22  ;;  %s408_s20 = sshll.u32 %s583_s4, 4  ;;  %s409_s20 = int_to_ptr.vmem [resolvable:$true] %s408_s20 }
  0x24   :  { %459 = vmatprep.subr.mxu1 %v581_v0  ;;  %478 = vmatprep.subr.mxu0 %v581_v0  ;;  %s551_s21 = scalar_lea.vmem %s409_s20, 128  ;;  %p556_p11 = scmp.lt.s32.totalorder %s409_s20, %s409_s20 }
  0x25   :  { %460 = vmatpush3.msra.mxu1 %v138_v6  ;;  %479 = vmatpush3.msra.mxu0 %v221_v23  ;;  %p552_p10 = scmp.ne.s32.totalorder %s409_s20, %s551_s21  ;;  %p557_p12 = scmp.lt.s32.totalorder %s551_s21, %s551_s21 }
  0x26   :  { %461 = vmatprep.subr.mxu1 %v581_v0  ;;  %480 = vmatprep.subr.mxu0 %v581_v0 }
  0x27   :  { %462 = vmatpush3.msra.mxu1 %v137_v7  ;;  %481 = vmatpush3.msra.mxu0 %v220_v24  ;;  %p558_p13 = por %p557_p12, %p556_p11 }
  0x28   :  { %463 = vmatprep.subr.mxu1 %v581_v0  ;;  %485 = vmatprep.subr.mxu0 %v581_v0 }
  0x29   :  { %464 = vmatpush3.msra.mxu1 %v136_v8  ;;  %p559_p0 = pnand %p558_p13, %p552_p10 }
  0x2a   :  { %465 = vmatprep.subr.mxu1 %v581_v0 }
  0x2b   :  { %466 = vmatpush3.msra.mxu1 %v135_v9 }
  0x2c   :  { %467 = vmatprep.subr.mxu1 %v581_v0 }
  0x2d   :  { %468 = vmatpush3.msra.mxu1 %v134_v10 }
  0x2e   :  { %469 = vmatprep.subr.mxu1 %v581_v0 }
  0x2f   :  { %470 = vmatpush3.msra.mxu1 %v133_v11 }
  0xe0   :  { %v128_v18 = vpop.f32.mrf.mxu1 }
  0xe1   :  { %v129_v19 = vadd.f32 %v128_v18, %v57_v17 }
  0xe2   :  { %v454_v20 = vpop.f32.mrf.mxu1 }
  0xe3   :  { %v132_v21 = vmax.f32 %v129_v19, 0.0 }
  0xe5   :  { %472 = vmatmul.mubr.msk.f32.vlgmr.msra.gmra.mxu1 %vm145_vm2, %v132_v21 }
 0x1a5   :  { %v215_v27 = vpop.f32.mrf.mxu1 }
 0x1a6   :  { %v216_v28 = vadd.f32 %v215_v27, %v144_v26 }
 0x1a7   :  { %v473_v29 = vpop.f32.mrf.mxu1 }
 0x1a8   :  { %v219_v30 = vmax.f32 %v216_v28, 0.0 }
 0x1aa   :  { %483 = vmatmul.mubr.msk.f32.vlgmr.msra.gmra.mxu0 %vm228_vm3, %v219_v30 }
 0x1ab   :  { %486 = vmatpush3.msra.mxu0 %v310_v31  ;;  %501 = vmatprep.mubr.msk.f32.mxu0 %vm582_vm0, %v581_v0 }
 0x1ac   :  { %487 = vmatprep.subr.mxu0 %v581_v0 }
 0x1ad   :  { %488 = vmatpush3.msra.mxu0 %v309_v32 }
 0x1ae   :  { %489 = vmatprep.subr.mxu0 %v581_v0 }
 0x1af   :  { %490 = vmatpush3.msra.mxu0 %v308_v33 }
 0x1b0   :  { %491 = vmatprep.subr.mxu0 %v581_v0 }
 0x1b1   :  { %492 = vmatpush3.msra.mxu0 %v307_v34 }
 0x1b2   :  { %493 = vmatprep.subr.mxu0 %v581_v0 }
 0x1b3   :  { %494 = vmatpush3.msra.mxu0 %v306_v35 }
 0x1b4   :  { %495 = vmatprep.subr.mxu0 %v581_v0 }
 0x1b5   :  { %496 = vmatpush3.msra.mxu0 %v305_v36 }
 0x1b6   :  { %497 = vmatprep.subr.mxu0 %v581_v0 }
 0x1b7   :  { %498 = vmatpush3.msra.mxu0 %v304_v37 }
 0x1b8   :  { %499 = vmatprep.subr.mxu0 %v581_v0 }
 0x1b9   :  { %500 = vmatpush3.msra.mxu0 %v303_v38 }
 0x26a   :  { %v298_v41 = vpop.f32.mrf.mxu0 }
 0x26b   :  { %v299_v42 = vadd.f32 %v298_v41, %v227_v40 }
 0x26c   :  { %v484_v43 = vpop.f32.mrf.mxu0 }
 0x26d   :  { %v302_v44 = vmax.f32 %v299_v42, 0.0 }
 0x26f   :  { %502 = vmatmul.mubr.msk.f32.vlgmr.msra.gmra.mxu0 %vm145_vm2, %v302_v44 }
 0x32f   :  { %v384_v48 = vpop.f32.mrf.mxu0 }
 0x330   :  { %v385_v49 = vadd.f32 %v384_v48, %v314_v47 }
 0x331   :  { %v503_v50 = vpop.f32.mrf.mxu0 }
 0x332   :  { %v391_v51 = vsel %vm390_vm4, %v385_v49, 0.0  ;;  %v395_v52 = vsel %vm394_vm5, %v385_v49, 0.0 }
 0x333   :  { %392 = vadd.xlane.f32.xlu0 %v391_v51 }
 0x337   :  { %396 = vadd.xlane.f32.xlu0 %v395_v52 }
 0x3bc   :  { %v393_v53 = vpop.xlane.xlu0 %392 }
 0x3bd   :  { %v399_v55 = vmul.f32 0.16666667, %v393_v53 }
 0x3c0   :  { %v397_v54 = vpop.xlane.xlu0 %396 }
 0x3c1   :  { %v398_v56 = vadd.f32 %v397_v54, %v385_v49 }
 0x3c3   :  { %v400_v57 = vsub.f32 %v398_v56, %v399_v55 }
 0x3c5   :  { %401 = vst [vmem:[#allocation7] sm:$0xff] %v400_v57 }
 0x3c6   :  { %562 = shalt.err (!%p559_p0)
}
 0x3c7   :  { %411 = dma.vmem_to_hbm [thread:$0]  %s409_s20, 128, %s729_s6, [#allocation4]  }
 0x3c8   :  { %575 = dma.done.wait [#allocation4], 128  }
 0x3c9   :  { %576 = vsyncadd [#allocation4], 4294967168 }
 0x3ca   :  { %415 = vsyncpa [#allocation3], 1 }
 0x3cb   :  { %416 = vsyncpa [#allocation6], 1 }
 0x3cc   :  { %417 = vsyncpa [#allocation4], 1 }

</bundles_post_ra>
